<compile_context>
chip_gen: v7x
topology: tpu7x:2x2x1
jax: 0.10.0
libtpu: 0.0.40
codegen_flags: <defaults>
</compile_context>

<pallas_src>
import math

import jax
import jax.numpy as jnp
import numpy as np
from jax.experimental import pallas as pl
from jax.experimental.pallas import tpu as pltpu

# --- vocab / constants (the original script builds vocab_x from a comma string) ---
vocab_x = "<SOS>,<EOS>,<PAD>,0,1,2,3,4,5,6,7,8,9"
vocab_x = {word: i for i, word in enumerate(vocab_x.split(","))}
DICT_SIZE = len(vocab_x)        # V = 13
SEQ_LEN = 10                    # S  (pe buffer is [1, 10, 32])
D_MODEL = 32                    # D


def _build_pe(seq_len: int, d_model: int) -> np.ndarray:
    """Matches the PyTorch get_pe loop exactly."""
    pe = np.empty((seq_len, d_model), dtype=np.float32)
    for i in range(seq_len):
        for j in range(d_model):
            d = 10000.0 ** (j / d_model)
            v = i / d
            pe[i, j] = math.sin(v) if j % 2 == 0 else math.cos(v)
    return pe


def _pos_embed_kernel(ids_ref, rep_ref, vmod_ref, w2_ref, pe_ref, out_ref):
    # ids_ref : VMEM [TB, S]     int32  token ids for this row tile
    # rep_ref : VMEM [S, S*V]    f32    repeat matrix  R[j, s*V+v] = (j == s)
    # vmod_ref: VMEM [1, S*V]    f32    column -> vocab index (v of column s*V+v)
    # w2_ref  : VMEM [S*V, S*D]  f32    block-diagonal embedding table
    # pe_ref  : VMEM [1, S*D]    f32    flattened positional encoding
    # out_ref : VMEM [TB, S*D]   f32    lane-dense output tile
    ids_f = ids_ref[...].astype(jnp.float32)                  # [TB, S]

    # Expand each token id across its V vocab lanes (exact: single 0/1 term per col).
    ids_rep = jnp.dot(ids_f, rep_ref[...],
                      preferred_element_type=jnp.float32)     # [TB, S*V]

    # Vectorized one-hot: onehot[b, s*V + v] = (ids[b, s] == v)
    onehot = (ids_rep == vmod_ref[...]).astype(jnp.float32)   # [TB, S*V]

    # Gather + flatten in one well-filled MXU matmul: [TB, S*V] @ [S*V, S*D].
    emb = jnp.dot(onehot, w2_ref[...],
                  preferred_element_type=jnp.float32)         # [TB, S*D]

    # Positional encoding broadcast over the row tile; lane-dense store.
    out_ref[...] = emb + pe_ref[...]


def position_embedding(ids: jax.Array, table: jax.Array, pe: jax.Array,
                       *, block_rows: int = 512) -> jax.Array:
    """embed(ids) + pe, ids:[B,S] int32, table:[V,D], pe:[S,D] -> [B,S,D] f32."""
    B, S = ids.shape
    V, D = table.shape

    # Row tile: multiple of 8 (sublane), capped so that once the batch is big
    # enough the grid has >= 2 parallel steps (keeps both v7x TensorCores busy).
    if B > 8:
        tb = min(block_rows, pl.cdiv(pl.cdiv(B, 2), 8) * 8)
    else:
        tb = pl.cdiv(B, 8) * 8
    tb = max(8, (tb // 8) * 8)
    b_pad = pl.cdiv(B, tb) * tb
    if b_pad != B:
        ids = jnp.pad(ids, ((0, b_pad - B), (0, 0)))          # pad id 0 (valid)

    # Small constant / parameter-derived inputs (built once per call in XLA):
    #   R[j, s*V+v]  = (j == s)            -> expands ids over vocab lanes
    #   vmod[s*V+v]  = v                   -> compare target for the one-hot
    #   W2[s*V+v, t*D+d] = (s==t)*table[v,d] -> gather + flatten in one matmul
    rep = jnp.repeat(jnp.eye(S, dtype=jnp.float32), V, axis=1)          # [S, S*V]
    vmod = jnp.tile(jnp.arange(V, dtype=jnp.float32), S).reshape(1, S * V)
    w2 = jnp.einsum("st,vd->svtd", jnp.eye(S, dtype=jnp.float32),
                    table.astype(jnp.float32)).reshape(S * V, S * D)    # [S*V, S*D]
    pe_flat = pe.astype(jnp.float32).reshape(1, S * D)                  # [1, S*D]

    out_flat = pl.pallas_call(
        _pos_embed_kernel,
        out_shape=jax.ShapeDtypeStruct((b_pad, S * D), jnp.float32),
        grid_spec=pltpu.PrefetchScalarGridSpec(
            num_scalar_prefetch=0,
            grid=(b_pad // tb,),
            in_specs=[
                pl.BlockSpec((tb, S), lambda i: (i, 0)),          # ids (row tile)
                pl.BlockSpec((S, S * V), lambda i: (0, 0)),       # R      (resident)
                pl.BlockSpec((1, S * V), lambda i: (0, 0)),       # vmod   (resident)
                pl.BlockSpec((S * V, S * D), lambda i: (0, 0)),   # W2     (resident)
                pl.BlockSpec((1, S * D), lambda i: (0, 0)),       # pe     (resident)
            ],
            out_specs=pl.BlockSpec((tb, S * D), lambda i: (i, 0)),
        ),
        compiler_params=pltpu.CompilerParams(
            dimension_semantics=("parallel",)),
    )(ids, rep, vmod, w2, pe_flat)

    return out_flat[:B].reshape(B, S, D)


if __name__ == "__main__":
    key = jax.random.PRNGKey(0)
    k_w, k_x, k_x2 = jax.random.split(key, 3)

    # Embedding weights ~ N(0, 0.1), as in embed.weight.data.normal_(0, 0.1)
    table = jax.random.normal(k_w, (DICT_SIZE, D_MODEL), dtype=jnp.float32) * 0.1
    pe = jnp.asarray(_build_pe(SEQ_LEN, D_MODEL))

    # Small case (single grid step, padded batch)
    B = 2
    ids = jax.random.randint(k_x, (B, SEQ_LEN), 0, DICT_SIZE, dtype=jnp.int32)
    out = jax.block_until_ready(position_embedding(ids, table, pe))
    ref = jnp.take(table, ids, axis=0) + pe[None, :, :]
    assert out.shape == (B, SEQ_LEN, D_MODEL)
    assert np.allclose(np.asarray(out), np.asarray(ref), atol=1e-5), "mismatch (B=2)"

    # Slightly larger case exercising batch padding + a multi-step parallel grid.
    B2 = 20
    ids2 = jax.random.randint(k_x2, (B2, SEQ_LEN), 0, DICT_SIZE, dtype=jnp.int32)
    out2 = jax.block_until_ready(position_embedding(ids2, table, pe))
    ref2 = jnp.take(table, ids2, axis=0) + pe[None, :, :]
    assert out2.shape == (B2, SEQ_LEN, D_MODEL)
    assert np.allclose(np.asarray(out2), np.asarray(ref2), atol=1e-5), "mismatch (B=20)"

    # TODO(synk): PyTorch nn.Embedding raises on out-of-range ids; the one-hot
    # gather here silently yields a zero embedding row for such ids instead.
    print("KERNEL_OK")
</pallas_src>

<mosaic_0001>
module attributes {stable_mosaic.version = 11 : i64} {
  func.func @_pos_embed_kernel(%arg0: i32, %arg1: memref<8x10xi32, #tpu.memory_space<vmem>>, %arg2: memref<10x130xf32, #tpu.memory_space<vmem>>, %arg3: memref<1x130xf32, #tpu.memory_space<vmem>>, %arg4: memref<130x320xf32, #tpu.memory_space<vmem>>, %arg5: memref<1x320xf32, #tpu.memory_space<vmem>>, %arg6: memref<8x320xf32, #tpu.memory_space<vmem>>) attributes {dimension_semantics = [#tpu.dimension_semantics<parallel>], iteration_bounds = array<i64: 1>, scalar_prefetch = 0 : i64, scratch_operands = 0 : i64, tpu.core_type = #tpu.core_type<tc>, window_params = [{transform_indices = @transform_0, window_bounds = array<i64: 8, 10>}, {pipeline_mode = #tpu.pipeline_mode<synchronous>, transform_indices = @transform_1, window_bounds = array<i64: 10, 130>}, {pipeline_mode = #tpu.pipeline_mode<synchronous>, transform_indices = @transform_2, window_bounds = array<i64: 1, 130>}, {pipeline_mode = #tpu.pipeline_mode<synchronous>, transform_indices = @transform_3, window_bounds = array<i64: 130, 320>}, {pipeline_mode = #tpu.pipeline_mode<synchronous>, transform_indices = @transform_4, window_bounds = array<i64: 1, 320>}, {transform_indices = @transform_5, window_bounds = array<i64: 8, 320>}]} {
    %c0 = arith.constant 0 : index
    %c0_0 = arith.constant 0 : index
    %0 = vector.load %arg1[%c0, %c0_0] : memref<8x10xi32, #tpu.memory_space<vmem>>, vector<8x10xi32>
    %1 = arith.sitofp %0 : vector<8x10xi32> to vector<8x10xf32>
    %c0_1 = arith.constant 0 : index
    %c0_2 = arith.constant 0 : index
    %2 = vector.load %arg2[%c0_1, %c0_2] : memref<10x130xf32, #tpu.memory_space<vmem>>, vector<10x130xf32>
    %cst = arith.constant dense<0.000000e+00> : vector<8x130xf32>
    %3 = tpu.matmul %1, %2, %cst {dimension_numbers = #tpu.dot_dimension_numbers<[1], [0], [0], [1], [0, 0, 1, 1], [], []>} : vector<8x10xf32>, vector<10x130xf32>, vector<8x130xf32> -> vector<8x130xf32>
    %c0_3 = arith.constant 0 : index
    %c0_4 = arith.constant 0 : index
    %4 = vector.load %arg3[%c0_3, %c0_4] : memref<1x130xf32, #tpu.memory_space<vmem>>, vector<1x130xf32>
    %5 = vector.broadcast %4 : vector<1x130xf32> to vector<8x130xf32>
    %6 = arith.cmpf oeq, %3, %5 : vector<8x130xf32>
    %7 = arith.extui %6 : vector<8x130xi1> to vector<8x130xi32>
    %8 = arith.sitofp %7 : vector<8x130xi32> to vector<8x130xf32>
    %c0_5 = arith.constant 0 : index
    %c0_6 = arith.constant 0 : index
    %9 = vector.load %arg4[%c0_5, %c0_6] : memref<130x320xf32, #tpu.memory_space<vmem>>, vector<130x320xf32>
    %cst_7 = arith.constant dense<0.000000e+00> : vector<8x320xf32>
    %10 = tpu.matmul %8, %9, %cst_7 {dimension_numbers = #tpu.dot_dimension_numbers<[1], [0], [0], [1], [0, 0, 1, 1], [], []>} : vector<8x130xf32>, vector<130x320xf32>, vector<8x320xf32> -> vector<8x320xf32>
    %c0_8 = arith.constant 0 : index
    %c0_9 = arith.constant 0 : index
    %11 = vector.load %arg5[%c0_8, %c0_9] : memref<1x320xf32, #tpu.memory_space<vmem>>, vector<1x320xf32>
    %12 = vector.broadcast %11 : vector<1x320xf32> to vector<8x320xf32>
    %13 = arith.addf %10, %12 : vector<8x320xf32>
    %c0_10 = arith.constant 0 : index
    %c0_11 = arith.constant 0 : index
    %14 = vector.load %arg6[%c0_10, %c0_11] : memref<8x320xf32, #tpu.memory_space<vmem>>, vector<8x320xf32>
    tpu.vector_store %arg6[%c0_10, %c0_11], %13 {strides = array<i32>} : memref<8x320xf32, #tpu.memory_space<vmem>>, vector<8x320xf32>,
    return
  }
  func.func @transform_0(%arg0: i32) -> (i32, i32) {
    %c0_i32 = arith.constant 0 : i32
    %c0_i32_0 = arith.constant 0 : i32
    return %arg0, %c0_i32 : i32, i32
  }
  func.func @transform_1(%arg0: i32) -> (i32, i32) {
    %c0_i32 = arith.constant 0 : i32
    %c0_i32_0 = arith.constant 0 : i32
    %c0_i32_1 = arith.constant 0 : i32
    return %c0_i32, %c0_i32_0 : i32, i32
  }
  func.func @transform_2(%arg0: i32) -> (i32, i32) {
    %c0_i32 = arith.constant 0 : i32
    %c0_i32_0 = arith.constant 0 : i32
    %c0_i32_1 = arith.constant 0 : i32
    return %c0_i32, %c0_i32_0 : i32, i32
  }
  func.func @transform_3(%arg0: i32) -> (i32, i32) {
    %c0_i32 = arith.constant 0 : i32
    %c0_i32_0 = arith.constant 0 : i32
    %c0_i32_1 = arith.constant 0 : i32
    return %c0_i32, %c0_i32_0 : i32, i32
  }
  func.func @transform_4(%arg0: i32) -> (i32, i32) {
    %c0_i32 = arith.constant 0 : i32
    %c0_i32_0 = arith.constant 0 : i32
    %c0_i32_1 = arith.constant 0 : i32
    return %c0_i32, %c0_i32_0 : i32, i32
  }
  func.func @transform_5(%arg0: i32) -> (i32, i32) {
    %c0_i32 = arith.constant 0 : i32
    %c0_i32_0 = arith.constant 0 : i32
    return %arg0, %c0_i32 : i32, i32
  }
}

</mosaic_0001>

<bundles_post_ra>
// kernel: tpu_custom_call.1
= control target key start
LH: loop header
LB: loop body
LE: loop exit
PB: predicated region body
PF: predicated region fallthrough
CT: control target
= control target key end

     0   :  { %10 = vsyncpa [#allocation3], 0  ;;  %s707_s0 = inlined_call_operand.hbm [shape: s32[8,10], index: 0, kind: input, shape index: {}]   ;;  %s708_s1 = inlined_call_operand.hbm [shape: f32[10,130], index: 1, kind: input, shape index: {}]   ;;  %s709_s2 = inlined_call_operand.vmem [shape: f32[1,130], index: 2, kind: input, shape index: {}]   ;;  %s710_s3 = inlined_call_operand.hbm [shape: f32[130,320], index: 3, kind: input, shape index: {}]   ;;  %s711_s4 = inlined_call_operand.vmem [shape: f32[1,320], index: 4, kind: input, shape index: {}]   ;;  %s712_s5 = inlined_call_operand.hbm [shape: f32[8,320], index: 5, kind: output, shape index: {}]  }
   0x1   :  { %11 = vsyncpa [#allocation6], 0 }
   0x2   :  { %12 = vsyncpa [#allocation4], 0  ;;  %s588_s18 = smov [#allocation5]   ;;  %s494_s22 = scalar_lea.hbm %s708_s1, 512 }
   0x3   :  { %s28_s19 = sshll.u32 %s588_s18, 4  ;;  %p495_p0 = scmp.ne.s32.totalorder %s708_s1, %s494_s22  ;;  %s29_s19 = int_to_ptr.vmem [resolvable:$true] %s28_s19 }
   0x4   :  { %p498_p1 = scmp.lt.u32.totalorder %s494_s22, %s708_s1 }
   0x6   :  { %p500_p2 = pnand %p498_p1, %p495_p0 }
   0x8   :  { %503 = shalt.err (!%p500_p2)
}
   0x9   :  { %s504_s27 = scalar_lea.vmem %s29_s19, 512  ;;  %p509_p4 = scmp.lt.s32.totalorder %s29_s19, %s29_s19 }
   0xa   :  { %p505_p3 = scmp.ne.s32.totalorder %s29_s19, %s504_s27  ;;  %p510_p5 = scmp.lt.s32.totalorder %s504_s27, %s504_s27 }
   0xc   :  { %p511_p6 = por %p510_p5, %p509_p4 }
   0xe   :  { %p512_p7 = pnand %p511_p6, %p505_p3 }
  0x10   :  { %515 = shalt.err (!%p512_p7)
}
  0x11   :  { %s589_s28 = smov 256   ;;  %s590_s29 = smov 16  }
  0x12   :  { %34 = dma.hbm_to_vmem [thread:$0]  %s708_s1, 512, %s29_s19, [#allocation6], %s589_s28, %s589_s28, %s590_s29  }
  0x13   :  { %s591_s7 = smov [#allocation2]   ;;  %s592_s9 = smov [#allocation7]  }
  0x14   :  { %s19_s8 = sshll.u32 %s591_s7, 4  ;;  %s42_s10 = sshll.u32 %s592_s9, 4  ;;  %s20_s8 = int_to_ptr.vmem [resolvable:$true] %s19_s8  ;;  %s43_s10 = int_to_ptr.vmem [resolvable:$true] %s42_s10 }
  0x15   :  { %s516_s13 = scalar_lea.hbm %s707_s0, 128 }
  0x16   :  { %p517_p8 = scmp.ne.s32.totalorder %s707_s0, %s516_s13  ;;  %p520_p9 = scmp.lt.u32.totalorder %s516_s13, %s707_s0 }
  0x18   :  { %p522_p10 = pnand %p520_p9, %p517_p8 }
  0x1a   :  { %525 = shalt.err (!%p522_p10)
}
  0x1b   :  { %s526_s1 = scalar_lea.vmem %s20_s8, 128  ;;  %p531_p12 = scmp.lt.s32.totalorder %s20_s8, %s20_s8 }
  0x1c   :  { %p527_p11 = scmp.ne.s32.totalorder %s20_s8, %s526_s1  ;;  %p532_p13 = scmp.lt.s32.totalorder %s526_s1, %s526_s1 }
  0x1e   :  { %p533_p0 = por %p532_p13, %p531_p12 }
  0x20   :  { %p534_p1 = pnand %p533_p0, %p527_p11 }
  0x22   :  { %537 = shalt.err (!%p534_p1)
}
  0x23   :  { %22 = dma.hbm_to_vmem [thread:$0]  %s707_s0, 128, %s20_s8, [#allocation3]  }
  0x24   :  { %s538_s22 = scalar_lea.hbm %s710_s3, 6528 }
  0x25   :  { %p539_p2 = scmp.ne.s32.totalorder %s710_s3, %s538_s22  ;;  %p542_p3 = scmp.lt.u32.totalorder %s538_s22, %s710_s3 }
  0x27   :  { %p544_p4 = pnand %p542_p3, %p539_p2 }
  0x29   :  { %547 = shalt.err (!%p544_p4)
}
  0x2a   :  { %s548_s27 = scalar_lea.vmem %s43_s10, 6528  ;;  %p553_p6 = scmp.lt.s32.totalorder %s43_s10, %s43_s10 }
  0x2b   :  { %p549_p5 = scmp.ne.s32.totalorder %s43_s10, %s548_s27  ;;  %p554_p7 = scmp.lt.s32.totalorder %s548_s27, %s548_s27 }
  0x2d   :  { %p555_p8 = por %p554_p7, %p553_p6 }
  0x2f   :  { %p556_p9 = pnand %p555_p8, %p549_p5 }
  0x31   :  { %559 = shalt.err (!%p556_p9)
}
  0x32   :  { %s593_s0 = smov 384   ;;  %s594_s28 = smov 24  }
  0x33   :  { %48 = dma.hbm_to_vmem [thread:$0]  %s710_s3, 6528, %s43_s10, [#allocation6], %s593_s0, %s593_s0, %s594_s28  }
  0x34   :  { %582 = dma.done.wait [#allocation3], 128  }
  0x35   :  { %583 = vsyncadd [#allocation3], 4294967168 }
  0x36   :  { %584 = dma.done.wait [#allocation6], 7040  }
  0x37   :  { %585 = vsyncadd [#allocation6], 4294960256  ;;  %v595_v0 = vmov 0.0   ;;  %vm70_vm0 = vcmask 1041408   ;;  %vm596_vm1 = vmmov 1   ;;  %v63_v2 = vld [vmem:[#allocation5 + $0x8] sm:$0xff] }
  0x38   :  { %141 = vmatprep.mubr.f32.mxu0 %v595_v0  ;;  %vm668_vm2 = vmpackc.low %vm70_vm0, %vm596_vm1  ;;  %v65_v3 = vld [vmem:[#allocation5 + $0x18] sm:$0x3]  ;;  %v62_v4 = vld [vmem:[#allocation5] sm:$0xff]  ;;  %vm66_vm3 = vcmask 80896   ;;  %v597_v23 = vmov 0.0|0.0   ;;  %vm234_vm4 = vcmask 15360  }
  0x39   :  { %v420_v5 = vpack.c.bf16 %v65_v3, %v63_v2  ;;  %v64_v6 = vld [vmem:[#allocation5 + $0x10] sm:$0x3]  ;;  %v60_v7 = vld [vmem:[#allocation2] sm:$0xff]  ;;  %v167_v8 = vld [vmem:[#allocation7 + $0x8] sm:$0xff]  ;;  %vm390_vm7 = vcmask 523264  }
  0x3a   :  { %v423_v9 = vpack.c.bf16 %v64_v6, %v62_v4  ;;  %v170_v10 = vld [vmem:[#allocation7 + $0x20] sm:$0xff]  ;;  %v169_v12 = vld [vmem:[#allocation7 + $0x18] sm:$0xff]  ;;  %v61_v13 = vcvt.s32.f32 %v60_v7  ;;  %v168_v16 = vld [vmem:[#allocation7 + $0x10] sm:$0xff] }
  0x3b   :  { %v166_v11 = vld [vmem:[#allocation7] sm:$0xff]  ;;  %422 = vmatprep.subr.msk.bf16.mxu0 %vm668_vm2, %v420_v5  ;;  %v426_v14 = vpack.c.bf16 %v170_v10, %v167_v8  ;;  %v171_v17 = vld [vmem:[#allocation7 + $0x28] sm:$0xff]  ;;  %v173_v18 = vld [vmem:[#allocation7 + $0x38] sm:$0xff] }
  0x3c   :  { %v428_v15 = vpack.c.bf16 %v169_v12, %v166_v11  ;;  %425 = vmatpush1.bf16.msk.msra.mxu0 %vm668_vm2, %v423_v9  ;;  %v459_v19 = vpack.c.bf16 %v171_v17, %v168_v16  ;;  %v176_v20 = vld [vmem:[#allocation7 + $0x50] sm:$0xff]  ;;  %v175_v22 = vld [vmem:[#allocation7 + $0x48] sm:$0xff]  ;;  %v174_v25 = vld [vmem:[#allocation7 + $0x40] sm:$0xff] }
  0x3d   :  { %v172_v21 = vld [vmem:[#allocation7 + $0x30] sm:$0xff]  ;;  %427 = vmatprep.subr.bf16.mxu1 %v426_v14  ;;  %458 = vmatprep.subr.bf16.mxu0 %v597_v23  ;;  %v430_v24 = vpack.c.bf16 %v176_v20, %v173_v18  ;;  %v177_v26 = vld [vmem:[#allocation7 + $0x58] sm:$0xff]  ;;  %v179_v27 = vld [vmem:[#allocation7 + $0x68] sm:$0xff] }
  0x3e   :  { %429 = vmatpush1.bf16.msra.mxu1 %v428_v15  ;;  %v432_v28 = vpack.c.bf16 %v175_v22, %v172_v21  ;;  %v182_v29 = vld [vmem:[#allocation7 + $0x80] sm:$0xff]  ;;  %v181_v32 = vld [vmem:[#allocation7 + $0x78] sm:$0xff]  ;;  %v462_v33 = vpack.c.bf16 %v177_v26, %v174_v25  ;;  %v188_v35 = vld [vmem:[#allocation7 + $0xb0] sm:$0xff] }
  0x3f   :  { %410 = vmatmul.mubr.msk.f32.vlgmr.msra.gmra.mrb[0].mxu0 %vm66_vm3, %v61_v13  ;;  %431 = vmatprep.subr.bf16.mxu1 %v430_v24  ;;  %v434_v30 = vpack.c.bf16 %v182_v29, %v179_v27  ;;  %v178_v31 = vld [vmem:[#allocation7 + $0x60] sm:$0xff]  ;;  %v185_v34 = vld [vmem:[#allocation7 + $0x98] sm:$0xff]  ;;  %v180_v36 = vld [vmem:[#allocation7 + $0x70] sm:$0xff] }
  0x40   :  { %460 = vmatpush1.bf16.msra.mxu0 %v459_v19  ;;  %v183_v37 = vld [vmem:[#allocation7 + $0x88] sm:$0xff]  ;;  %v436_v38 = vpack.c.bf16 %v181_v32, %v178_v31  ;;  %v438_v39 = vpack.c.bf16 %v188_v35, %v185_v34  ;;  %v184_v40 = vld [vmem:[#allocation7 + $0x90] sm:$0xff]  ;;  %v194_v44 = vld [vmem:[#allocation7 + $0xe0] sm:$0xff] }
  0x41   :  { %461 = vmatprep.subr.bf16.mxu0 %v597_v23  ;;  %v187_v41 = vld [vmem:[#allocation7 + $0xa8] sm:$0xff]  ;;  %v465_v42 = vpack.c.bf16 %v183_v37, %v180_v36  ;;  %v186_v45 = vld [vmem:[#allocation7 + $0xa0] sm:$0xff]  ;;  %v189_v46 = vld [vmem:[#allocation7 + $0xb8] sm:$0xff] }
  0x42   :  { %433 = vmatpush1.bf16.msra.mxu1 %v432_v28  ;;  %v191_v43 = vld [vmem:[#allocation7 + $0xc8] sm:$0xff]  ;;  %v440_v47 = vpack.c.bf16 %v187_v41, %v184_v40  ;;  %v190_v49 = vld [vmem:[#allocation7 + $0xc0] sm:$0xff]  ;;  %v193_v50 = vld [vmem:[#allocation7 + $0xd8] sm:$0xff]  ;;  %v468_v51 = vpack.c.bf16 %v189_v46, %v186_v45 }
  0x43   :  { %435 = vmatprep.subr.bf16.mxu1 %v434_v30  ;;  %v442_v48 = vpack.c.bf16 %v194_v44, %v191_v43  ;;  %v197_v52 = vld [vmem:[#allocation7 + $0xf8] sm:$0xff]  ;;  %v200_v53 = vld [vmem:[#allocation7 + $0x110] sm:$0xff]  ;;  %v195_v55 = vld [vmem:[#allocation7 + $0xe8] sm:$0xff]  ;;  %v444_v56 = vpack.c.bf16 %v193_v50, %v190_v49 }
  0x44   :  { %463 = vmatpush1.bf16.msra.mxu0 %v462_v33  ;;  %v192_v54 = vld [vmem:[#allocation7 + $0xd0] sm:$0xff]  ;;  %v446_v57 = vpack.c.bf16 %v200_v53, %v197_v52  ;;  %v199_v59 = vld [vmem:[#allocation7 + $0x108] sm:$0xff]  ;;  %v206_v62 = vld [vmem:[#allocation7 + $0x140] sm:$0xff]  ;;  %v598_v33 = vmov 1.0  }
  0x45   :  { %464 = vmatprep.subr.bf16.mxu0 %v597_v23  ;;  %v196_v58 = vld [vmem:[#allocation7 + $0xf0] sm:$0xff]  ;;  %v471_v60 = vpack.c.bf16 %v195_v55, %v192_v54  ;;  %v203_v61 = vld [vmem:[#allocation7 + $0x128] sm:$0xff]  ;;  %v198_v63 = vld [vmem:[#allocation7 + $0x100] sm:$0xff] }
  0x46   :  { %437 = vmatpush1.bf16.msra.mxu1 %v436_v38  ;;  %v201_v1 = vld [vmem:[#allocation7 + $0x118] sm:$0xff]  ;;  %v448_v2 = vpack.c.bf16 %v199_v59, %v196_v58  ;;  %v450_v3 = vpack.c.bf16 %v206_v62, %v203_v61  ;;  %v202_v4 = vld [vmem:[#allocation7 + $0x120] sm:$0xff]  ;;  %v212_v8 = vld [vmem:[#allocation7 + $0x170] sm:$0xff] }
  0x47   :  { %439 = vmatprep.subr.bf16.mxu1 %v438_v39  ;;  %v205_v5 = vld [vmem:[#allocation7 + $0x138] sm:$0xff]  ;;  %v474_v6 = vpack.c.bf16 %v201_v1, %v198_v63  ;;  %v204_v9 = vld [vmem:[#allocation7 + $0x130] sm:$0xff]  ;;  %v207_v10 = vld [vmem:[#allocation7 + $0x148] sm:$0xff] }
  0x48   :  { %466 = vmatpush1.bf16.msra.mxu0 %v465_v42  ;;  %v209_v7 = vld [vmem:[#allocation7 + $0x158] sm:$0xff]  ;;  %v452_v11 = vpack.c.bf16 %v205_v5, %v202_v4  ;;  %v477_v13 = vpack.c.bf16 %v207_v10, %v204_v9  ;;  %v208_v14 = vld [vmem:[#allocation7 + $0x150] sm:$0xff]  ;;  %v211_v15 = vld [vmem:[#allocation7 + $0x168] sm:$0xff] }
  0x49   :  { %467 = vmatprep.subr.bf16.mxu0 %v597_v23  ;;  %v454_v12 = vpack.c.bf16 %v212_v8, %v209_v7  ;;  %v210_v16 = vld [vmem:[#allocation7 + $0x160] sm:$0xff]  ;;  %v456_v17 = vpack.c.bf16 %v211_v15, %v208_v14  ;;  %v213_v18 = vld [vmem:[#allocation7 + $0x178] sm:$0xff]  ;;  %v215_v20 = vld [vmem:[#allocation7 + $0x188] sm:$0x3] }
  0x4a   :  { %441 = vmatpush1.bf16.msra.mxu1 %v440_v47  ;;  %v480_v19 = vpack.c.bf16 %v213_v18, %v210_v16  ;;  %v214_v21 = vld [vmem:[#allocation7 + $0x180] sm:$0x3]  ;;  %v216_v22 = vld [vmem:[#allocation7 + $0x190] sm:$0x3]  ;;  %v148_v26 = vld [vmem:[%s709_s2] sm:$0x3] }
  0x4b   :  { %443 = vmatprep.subr.bf16.mxu1 %v442_v48  ;;  %v217_v35 = vld [vmem:[%s711_s4] sm:$0x7]  ;;  %s599_s2 = smov [#allocation8]  }
  0x4c   :  { %469 = vmatpush1.bf16.msra.mxu0 %v468_v51  ;;  %s398_s9 = sshll.u32 %s599_s2, 4  ;;  %s399_s9 = int_to_ptr.vmem [resolvable:$true] %s398_s9 }
  0x4d   :  { %470 = vmatprep.subr.bf16.mxu0 %v597_v23  ;;  %s560_s10 = scalar_lea.vmem %s399_s9, 384  ;;  %p565_p11 = scmp.lt.s32.totalorder %s399_s9, %s399_s9 }
  0x4e   :  { %445 = vmatpush1.bf16.msra.mxu1 %v444_v56  ;;  %p561_p10 = scmp.ne.s32.totalorder %s399_s9, %s560_s10  ;;  %p566_p12 = scmp.lt.s32.totalorder %s560_s10, %s560_s10 }
  0x4f   :  { %447 = vmatprep.subr.bf16.mxu1 %v446_v57 }
  0x50   :  { %472 = vmatpush1.bf16.msra.mxu0 %v471_v60  ;;  %p567_p13 = por %p566_p12, %p565_p11 }
  0x51   :  { %473 = vmatprep.subr.bf16.mxu0 %v597_v23 }
  0x52   :  { %449 = vmatpush1.bf16.msra.mxu1 %v448_v2  ;;  %p568_p0 = pnand %p567_p13, %p561_p10 }
  0x53   :  { %451 = vmatprep.subr.bf16.mxu1 %v450_v3 }
  0x54   :  { %475 = vmatpush1.bf16.msra.mxu0 %v474_v6 }
  0x55   :  { %476 = vmatprep.subr.bf16.mxu0 %v597_v23 }
  0x56   :  { %453 = vmatpush1.bf16.msra.mxu1 %v452_v11 }
  0x57   :  { %455 = vmatprep.subr.bf16.mxu1 %v454_v12 }
  0x58   :  { %478 = vmatpush1.bf16.msra.mxu0 %v477_v13 }
  0x59   :  { %479 = vmatprep.subr.bf16.mxu0 %v597_v23  ;;  %v150_v23 = vlaneseq }
  0x5a   :  { %457 = vmatpush1.bf16.msra.mxu1 %v456_v17 }
  0x5b   :  { %413 = vmatprep.subr.msk.mxu1 %vm70_vm0, %v215_v20  ;;  %v151_v24 = vshrl.u32 %v150_v23, 7 }
  0x5c   :  { %481 = vmatpush1.bf16.msra.mxu0 %v480_v19 }
  0x5d   :  { %350 = vmatprep.subr.mxu0 %v595_v0  ;;  %v156_v25 = vsub.s32 1, %v151_v24  ;;  %v152_v27 = vsub.s32 0, %v151_v24  ;;  %v229_v34 = vsub.s32 2, %v151_v24 }
  0x5e   :  { %414 = vmatpush1.msk.msra.mxu1 %vm70_vm0, %v214_v21 }
  0x5f   :  { %v157_v28 = vrot.slane %v148_v26, %v156_v25  ;;  %v153_v30 = vrot.slane %v148_v26, %v152_v27  ;;  %v222_v36 = vrot.slane %v217_v35, %v152_v27  ;;  %v230_v37 = vrot.slane %v217_v35, %v229_v34 }
  0x60   :  { %417 = vmatpush1.msk.msra.mxu0 %vm70_vm0, %v216_v22  ;;  %v226_v38 = vrot.slane %v217_v35, %v156_v25 }
 0x112   :  { %v143_v29 = vpop.f32.mrb[0].mxu0 }
 0x113   :  { %v145_v31 = vpop.f32.mrb[1].mxu0  ;;  %vm160_vm6 = vcmp.eq.f32.partialorder %v143_v29, %v153_v30 }
 0x114   :  { %vm161_vm5 = vcmp.eq.f32.partialorder %v145_v31, %v157_v28 }
 0x115   :  { %v412_v32 = vsel %vm161_vm5, 1.0, %v595_v0 }
 0x116   :  { %415 = vmatprep.mubr.msk.f32.mxu1 %vm234_vm4, %v412_v32  ;;  %418 = vmatprep.mubr.msk.f32.mxu0 %vm234_vm4, %v412_v32 }
 0x117   :  { %416 = vmatmul.mubr.msk.f32.vlgmr.msra.gmra.mrb[0].mxu1 %vm160_vm6, %v598_v33  ;;  %419 = vmatmul.mubr.msk.f32.vlgmr.msra.gmra.mrb[2].mxu0 %vm160_vm6, %v598_v33 }
 0x1ea   :  { %v313_v39 = vpop.f32.mrb[0].mxu1  ;;  %v384_v40 = vpop.f32.mrb[2].mxu0 }
 0x1eb   :  { %v314_v0 = vadd.f32 %v313_v39, %v222_v36  ;;  %v385_v41 = vadd.f32 %v384_v40, %v230_v37  ;;  %v315_v42 = vpop.f32.mrb[1].mxu1  ;;  %v386_v43 = vpop.f32.mrb[3].mxu0 }
 0x1ec   :  { %v316_v44 = vadd.f32 %v315_v42, %v226_v38 }
 0x1ed   :  { %388 = vst [vmem:[#allocation8] sm:$0xff] %v314_v0  ;;  %391 = vst.msk [vmem:[#allocation8 + $0x10] sm:$0xff] %vm390_vm7, %v385_v41 }
 0x1ee   :  { %389 = vst [vmem:[#allocation8 + $0x8] sm:$0xff] %v316_v44 }
 0x1ef   :  { %571 = shalt.err (!%p568_p0)
}
 0x1f0   :  { %s572_s12 = scalar_lea.hbm %s712_s5, 384 }
 0x1f1   :  { %p573_p1 = scmp.ne.s32.totalorder %s712_s5, %s572_s12  ;;  %p576_p2 = scmp.lt.u32.totalorder %s572_s12, %s712_s5 }
 0x1f3   :  { %p578_p3 = pnand %p576_p2, %p573_p1 }
 0x1f5   :  { %581 = shalt.err (!%p578_p3)
}
 0x1f6   :  { %401 = dma.vmem_to_hbm [thread:$0]  %s399_s9, 384, %s712_s5, [#allocation4]  }
 0x1f7   :  { %586 = dma.done.wait [#allocation4], 384  }
 0x1f8   :  { %587 = vsyncadd [#allocation4], 4294966912 }
 0x1f9   :  { %405 = vsyncpa [#allocation3], 1 }
 0x1fa   :  { %406 = vsyncpa [#allocation6], 1 }
 0x1fb   :  { %407 = vsyncpa [#allocation4], 1 }

</bundles_post_ra>
